<compile_context>
chip_gen: v7x
topology: tpu7x:2x2x1
jax: 0.10.0
libtpu: 0.0.40
codegen_flags: <defaults>
</compile_context>

<pallas_src>
import jax
import jax.numpy as jnp
from jax.experimental import pallas as pl
from jax.experimental.pallas import tpu as pltpu

_MIN_X_TILE_BYTES = 2 * 1024 * 1024          # keep per-step x tiles >= ~2 MiB
_VMEM_LIMIT_CAP = 112 * 1024 * 1024          # never ask Mosaic for more than this
_FALLBACK_VMEM_CAPACITY = 64 * 1024 * 1024   # v7x per-TensorCore VMEM (safe minimum)


def mean_pool_kernel(x_ref, m_ref, o_ref, den_ref):
    # x_ref:   (tb, ts, H) hidden-state tile (native dtype)
    # m_ref:   (tb, ts)    attention-mask tile (32-bit), ts on the lane axis
    # o_ref:   (tb, H)     float32 output block, resident across the S axis
    # den_ref: (tb, 1)     float32 mask-sum accumulator (VMEM scratch)
    s = pl.program_id(1)

    @pl.when(s == 0)
    def _init():
        o_ref[...] = jnp.zeros_like(o_ref)
        den_ref[...] = jnp.zeros_like(den_ref)

    x = x_ref[...]
    m32 = m_ref[...].astype(jnp.float32)              # read + cast the mask once
    m_mm = m32 if x.dtype == jnp.float32 else m32.astype(x.dtype)  # 0/1 -> exact

    # Masked sum over this S tile on the MXU with f32 accumulation:
    #   (tb, 1, ts) @ (tb, ts, H) -> (tb, 1, H).
    # The mask/output-sized relayouts around the batched matmul are ~1/H of the
    # x stream and stay hidden under the x DMA (kernel is HBM-bound).
    num = jax.lax.dot_general(
        m_mm[:, None, :], x,
        dimension_numbers=(((2,), (1,)), ((0,), (0,))),
        preferred_element_type=jnp.float32,
    )
    o_ref[...] += num[:, 0, :]
    den_ref[...] += jnp.sum(m32, axis=1, keepdims=True)

    @pl.when(s == pl.num_programs(1) - 1)
    def _finalize():
        den = jnp.maximum(den_ref[...], 1e-9)         # torch.clamp(min=1e-9)
        o_ref[...] = o_ref[...] * pl.reciprocal(den, approx=False)


def _vmem_capacity_bytes():
    try:
        cap = getattr(pltpu.get_tpu_info(), "vmem_capacity_bytes", None)
        if cap:
            return int(cap)
    except Exception:
        pass
    return _FALLBACK_VMEM_CAPACITY


def _row_bytes(S, ts, H, x_bytes):
    # Working set per batch row per grid step:
    # x tile + 32-bit mask tile + f32 output block + f32 denominator.
    return ts * H * x_bytes + ts * 4 + H * 4 + 4


def _pick_batch_tile(B, S, ts, H, x_bytes, budget_bytes):
    """Batch tile from {B} U multiples-of-8 whose double-buffered working set
    fits the budget. Prefers >=4 grid steps with >= ~2 MiB x tiles (even step
    counts first, balancing v7x's 2 TensorCores), then >=2 steps, then the
    largest fitting tile. Returns None if nothing fits."""
    cands = sorted({B} | set(range(8, B + 1, 8)))
    fitting = [t for t in cands
               if 2 * t * _row_bytes(S, ts, H, x_bytes) <= budget_bytes]
    if not fitting:
        return None

    def steps(t):
        return pl.cdiv(B, t)

    def best(pool):
        even = [t for t in pool if steps(t) % 2 == 0]
        return max(even) if even else max(pool)

    tier4 = [t for t in fitting
             if steps(t) >= 4 and t * ts * H * x_bytes >= _MIN_X_TILE_BYTES]
    if tier4:
        return best(tier4)
    tier2 = [t for t in fitting if steps(t) >= 2]
    if tier2:
        return best(tier2)
    return max(fitting)


def _pick_tiles(B, S, H, x_bytes, budget_bytes):
    # Full-S rows first (single reduction step per batch block).
    tb = _pick_batch_tile(B, S, S, H, x_bytes, budget_bytes)
    if tb is not None:
        return tb, S
    # Long sequences: split S into 128-aligned divisors so every block stays
    # (8,128)-legal and no ragged S padding can contaminate valid rows.
    for ts in sorted((d for d in range(128, S, 128) if S % d == 0), reverse=True):
        tb = _pick_batch_tile(B, S, ts, H, x_bytes, budget_bytes)
        if tb is not None:
            return tb, ts
    # TODO(synk): very long S with no 128-aligned divisor would need in-kernel
    # masking of a ragged S tile; fall back to the smallest legal batch tile.
    return min({B} | set(range(8, B + 1, 8))), S


def mean_pooling(last_hidden_state, attention_mask):
    """last_hidden_state: [B, S, H]; attention_mask: [B, S] (any numeric/bool dtype)."""
    B, S, H = last_hidden_state.shape
    assert attention_mask.shape == (B, S), (attention_mask.shape, (B, S))

    # Widen sub-32-bit masks so the (tb, ts) mask block only needs tb % 8
    # sublane tiling (int8/bool would need packed tiles); cost is ~1/H of the
    # x HBM stream, i.e. free.
    if jnp.dtype(attention_mask.dtype).itemsize != 4:
        attention_mask = attention_mask.astype(jnp.float32)

    x_bytes = jnp.dtype(last_hidden_state.dtype).itemsize

    vmem_capacity = _vmem_capacity_bytes()
    vmem_limit = min(int(0.8 * vmem_capacity), _VMEM_LIMIT_CAP)   # headroom
    budget = int(0.625 * vmem_capacity)                           # 2x-buffered tiles

    tb, ts = _pick_tiles(B, S, H, x_bytes, budget)
    grid = (pl.cdiv(B, tb), pl.cdiv(S, ts))

    return pl.pallas_call(
        mean_pool_kernel,
        out_shape=jax.ShapeDtypeStruct((B, H), jnp.float32),
        grid_spec=pltpu.PrefetchScalarGridSpec(
            num_scalar_prefetch=0,
            grid=grid,
            in_specs=[
                pl.BlockSpec((tb, ts, H), lambda b, s: (b, s, 0)),
                pl.BlockSpec((tb, ts), lambda b, s: (b, s)),
            ],
            out_specs=pl.BlockSpec((tb, H), lambda b, s: (b, 0)),
            scratch_shapes=[pltpu.VMEM((tb, 1), jnp.float32)],
        ),
        compiler_params=pltpu.CompilerParams(
            dimension_semantics=("parallel", "arbitrary"),
            vmem_limit_bytes=vmem_limit,
        ),
    )(last_hidden_state, attention_mask)


def mean_pooling_ref(last_hidden_state, attention_mask):
    m = attention_mask[..., None].astype(jnp.float32)
    x = last_hidden_state.astype(jnp.float32)
    num = jnp.sum(x * m, axis=1)
    den = jnp.maximum(jnp.sum(m, axis=1), 1e-9)
    return num / den


if __name__ == "__main__":
    B, S, H = 2, 8, 32
    key = jax.random.PRNGKey(0)
    k1, k2 = jax.random.split(key)
    last_hidden_state = jax.random.normal(k1, (B, S, H), dtype=jnp.float32)
    # Binary attention mask (ints, as a tokenizer would produce); ensure at
    # least one valid token per row.
    attention_mask = (jax.random.uniform(k2, (B, S)) > 0.3).astype(jnp.int32)
    attention_mask = attention_mask.at[:, 0].set(1)

    out = mean_pooling(last_hidden_state, attention_mask)
    out = jax.block_until_ready(out)

    ref = mean_pooling_ref(last_hidden_state, attention_mask)
    assert out.shape == (B, H)
    assert jnp.allclose(out, ref, atol=1e-5, rtol=1e-5), "mismatch vs reference"

    print("KERNEL_OK")
</pallas_src>

<mosaic_0001>
module attributes {stable_mosaic.version = 11 : i64} {
  func.func @mean_pool_kernel(%arg0: i32, %arg1: i32, %arg2: memref<2x8x32xf32, #tpu.memory_space<vmem>>, %arg3: memref<2x8xi32, #tpu.memory_space<vmem>>, %arg4: memref<2x32xf32, #tpu.memory_space<vmem>>, %arg5: memref<2x1xf32, #tpu.memory_space<vmem>>) attributes {dimension_semantics = [#tpu.dimension_semantics<parallel>, #tpu.dimension_semantics<arbitrary>], iteration_bounds = array<i64: 1, 1>, scalar_prefetch = 0 : i64, scratch_operands = 1 : i64, tpu.core_type = #tpu.core_type<tc>, window_params = [{transform_indices = @transform_0, window_bounds = array<i64: 2, 8, 32>}, {transform_indices = @transform_1, window_bounds = array<i64: 2, 8>}, {transform_indices = @transform_2, window_bounds = array<i64: 2, 32>}]} {
    %c0_i32 = arith.constant 0 : i32
    %0 = arith.cmpi eq, %arg1, %c0_i32 : i32
    %1 = arith.extui %0 : i1 to i32
    %c0_i32_0 = arith.constant 0 : i32
    %2 = arith.cmpi ne, %1, %c0_i32_0 : i32
    scf.if %2 {
      %cst_16 = arith.constant 0.000000e+00 : f32
      %20 = vector.broadcast %cst_16 : f32 to vector<2x32xf32>
      %c0_17 = arith.constant 0 : index
      %c0_18 = arith.constant 0 : index
      %21 = vector.load %arg4[%c0_17, %c0_18] : memref<2x32xf32, #tpu.memory_space<vmem>>, vector<2x32xf32>
      tpu.vector_store %arg4[%c0_17, %c0_18], %20 {strides = array<i32>} : memref<2x32xf32, #tpu.memory_space<vmem>>, vector<2x32xf32>,
      %cst_19 = arith.constant 0.000000e+00 : f32
      %22 = vector.broadcast %cst_19 : f32 to vector<2x1xf32>
      %c0_20 = arith.constant 0 : index
      %c0_21 = arith.constant 0 : index
      %23 = vector.load %arg5[%c0_20, %c0_21] : memref<2x1xf32, #tpu.memory_space<vmem>>, vector<2x1xf32>
      tpu.vector_store %arg5[%c0_20, %c0_21], %22 {strides = array<i32>} : memref<2x1xf32, #tpu.memory_space<vmem>>, vector<2x1xf32>,
    } else {
    }
    %c0 = arith.constant 0 : index
    %c0_1 = arith.constant 0 : index
    %c0_2 = arith.constant 0 : index
    %3 = vector.load %arg2[%c0, %c0_1, %c0_2] : memref<2x8x32xf32, #tpu.memory_space<vmem>>, vector<2x8x32xf32>
    %c0_3 = arith.constant 0 : index
    %c0_4 = arith.constant 0 : index
    %4 = vector.load %arg3[%c0_3, %c0_4] : memref<2x8xi32, #tpu.memory_space<vmem>>, vector<2x8xi32>
    %5 = arith.sitofp %4 : vector<2x8xi32> to vector<2x8xf32>
    %6 = vector.shape_cast %5 : vector<2x8xf32> to vector<2x1x8xf32>
    %cst = arith.constant dense<0.000000e+00> : vector<2x1x32xf32>
    %7 = tpu.matmul %6, %3, %cst {dimension_numbers = #tpu.dot_dimension_numbers<[2], [1], [1], [2], [0, 0, 0, 1, 1, 2], [0], [0]>} : vector<2x1x8xf32>, vector<2x8x32xf32>, vector<2x1x32xf32> -> vector<2x1x32xf32>
    %c0_5 = arith.constant 0 : index
    %c0_6 = arith.constant 0 : index
    %8 = vector.load %arg4[%c0_5, %c0_6] : memref<2x32xf32, #tpu.memory_space<vmem>>, vector<2x32xf32>
    %9 = vector.shape_cast %7 : vector<2x1x32xf32> to vector<2x32xf32>
    %10 = arith.addf %8, %9 : vector<2x32xf32>
    %c0_7 = arith.constant 0 : index
    %c0_8 = arith.constant 0 : index
    %11 = vector.load %arg4[%c0_7, %c0_8] : memref<2x32xf32, #tpu.memory_space<vmem>>, vector<2x32xf32>
    tpu.vector_store %arg4[%c0_7, %c0_8], %10 {strides = array<i32>} : memref<2x32xf32, #tpu.memory_space<vmem>>, vector<2x32xf32>,
    %c0_9 = arith.constant 0 : index
    %c0_10 = arith.constant 0 : index
    %12 = vector.load %arg5[%c0_9, %c0_10] : memref<2x1xf32, #tpu.memory_space<vmem>>, vector<2x1xf32>
    %cst_11 = arith.constant dense<0.000000e+00> : vector<2xf32>
    %13 = vector.multi_reduction <add>, %5, %cst_11 [1] : vector<2x8xf32> to vector<2xf32>
    %14 = vector.shape_cast %13 : vector<2xf32> to vector<2x1xf32>
    %15 = arith.addf %12, %14 : vector<2x1xf32>
    %c0_12 = arith.constant 0 : index
    %c0_13 = arith.constant 0 : index
    %16 = vector.load %arg5[%c0_12, %c0_13] : memref<2x1xf32, #tpu.memory_space<vmem>>, vector<2x1xf32>
    tpu.vector_store %arg5[%c0_12, %c0_13], %15 {strides = array<i32>} : memref<2x1xf32, #tpu.memory_space<vmem>>, vector<2x1xf32>,
    %c0_i32_14 = arith.constant 0 : i32
    %17 = arith.cmpi eq, %arg1, %c0_i32_14 : i32
    %18 = arith.extui %17 : i1 to i32
    %c0_i32_15 = arith.constant 0 : i32
    %19 = arith.cmpi ne, %18, %c0_i32_15 : i32
    scf.if %19 {
      %c0_16 = arith.constant 0 : index
      %c0_17 = arith.constant 0 : index
      %20 = vector.load %arg5[%c0_16, %c0_17] : memref<2x1xf32, #tpu.memory_space<vmem>>, vector<2x1xf32>
      %cst_18 = arith.constant 9.99999971E-10 : f32
      %21 = vector.broadcast %cst_18 : f32 to vector<2x1xf32>
      %22 = arith.maximumf %20, %21 : vector<2x1xf32>
      %c0_19 = arith.constant 0 : index
      %c0_20 = arith.constant 0 : index
      %23 = vector.load %arg4[%c0_19, %c0_20] : memref<2x32xf32, #tpu.memory_space<vmem>>, vector<2x32xf32>
      %24 = tpu.reciprocal %22 : vector<2x1xf32> -> vector<2x1xf32>
      %25 = vector.broadcast %24 : vector<2x1xf32> to vector<2x32xf32>
      %26 = arith.mulf %23, %25 : vector<2x32xf32>
      %c0_21 = arith.constant 0 : index
      %c0_22 = arith.constant 0 : index
      %27 = vector.load %arg4[%c0_21, %c0_22] : memref<2x32xf32, #tpu.memory_space<vmem>>, vector<2x32xf32>
      tpu.vector_store %arg4[%c0_21, %c0_22], %26 {strides = array<i32>} : memref<2x32xf32, #tpu.memory_space<vmem>>, vector<2x32xf32>,
    } else {
    }
    return
  }
  func.func @transform_0(%arg0: i32, %arg1: i32) -> (i32, i32, i32) {
    %c0_i32 = arith.constant 0 : i32
    %c0_i32_0 = arith.constant 0 : i32
    return %arg0, %arg1, %c0_i32 : i32, i32, i32
  }
  func.func @transform_1(%arg0: i32, %arg1: i32) -> (i32, i32) {
    %c0_i32 = arith.constant 0 : i32
    return %arg0, %arg1 : i32, i32
  }
  func.func @transform_2(%arg0: i32, %arg1: i32) -> (i32, i32) {
    %c0_i32 = arith.constant 0 : i32
    %c0_i32_0 = arith.constant 0 : i32
    return %arg0, %c0_i32 : i32, i32
  }
}

</mosaic_0001>

<bundles_post_ra>
// kernel: tpu_custom_call.1
= control target key start
LH: loop header
LB: loop body
LE: loop exit
PB: predicated region body
PF: predicated region fallthrough
CT: control target
= control target key end

     0   :  { %7 = vsyncpa [#allocation4], 0  ;;  %s383_s0 = inlined_call_operand.hbm [shape: f32[2,8,32], index: 0, kind: input, shape index: {}]   ;;  %s384_s1 = inlined_call_operand.vmem [shape: s32[2,8], index: 1, kind: input, shape index: {}]   ;;  %s385_s2 = inlined_call_operand.hbm [shape: f32[2,32], index: 2, kind: output, shape index: {}]  }
   0x1   :  { %8 = vsyncpa [#allocation5], 0  ;;  %s328_s9 = smov [#allocation3]   ;;  %s280_s13 = scalar_lea.hbm %s383_s0, 256 }
   0x2   :  { %s14_s10 = sshll.u32 %s328_s9, 4  ;;  %p281_p0 = scmp.ne.s32.totalorder %s383_s0, %s280_s13  ;;  %s15_s10 = int_to_ptr.vmem [resolvable:$true] %s14_s10 }
   0x3   :  { %p284_p1 = scmp.lt.u32.totalorder %s280_s13, %s383_s0 }
   0x5   :  { %p286_p2 = pnand %p284_p1, %p281_p0 }
   0x7   :  { %289 = shalt.err (!%p286_p2)
}
   0x8   :  { %s290_s18 = scalar_lea.vmem %s15_s10, 256  ;;  %p295_p4 = scmp.lt.s32.totalorder %s15_s10, %s15_s10 }
   0x9   :  { %p291_p3 = scmp.ne.s32.totalorder %s15_s10, %s290_s18  ;;  %p296_p5 = scmp.lt.s32.totalorder %s290_s18, %s290_s18 }
   0xb   :  { %p297_p6 = por %p296_p5, %p295_p4 }
   0xd   :  { %p298_p7 = pnand %p297_p6, %p291_p3 }
   0xf   :  { %301 = shalt.err (!%p298_p7)
}
  0x10   :  { %s329_s19 = smov 128   ;;  %s330_s20 = smov 8  }
  0x11   :  { %20 = dma.hbm_to_vmem [thread:$0]  %s383_s0, 256, %s15_s10, [#allocation4], %s329_s19, %s329_s19, %s330_s20  }
  0x12   :  { %324 = dma.done.wait [#allocation4], 256  }
  0x13   :  { %325 = vsyncadd [#allocation4], 4294967040  ;;  %v42_v0 = vlaneseq  ;;  %v331_v1 = vmov 1966171168   ;;  %v332_v3 = vmov 0.0   ;;  %vm32_vm0 = vcmask 1024  }
  0x14   :  { %v40_v2 = vunpack.c.l.s4 %v331_v1  ;;  %264 = vmatprep.subr.mxu1 %v332_v3  ;;  %259 = vmatprep.subr.mxu0 %v332_v3  ;;  %vm333_vm1 = vmmov 0   ;;  %33 = vst.msk [vmem:[#allocation2] sm:$0x3] %vm32_vm0, %v332_v3  ;;  %v36_v7 = vld [vmem:[%s384_s1] sm:$0x3]  ;;  %vm217_vm2 = vcmask 58368  }
  0x15   :  { %v43_v4 = vshrl.u32 %v42_v0, 7  ;;  %266 = vmatprep.mubr.msk.f32.mxu1 %vm333_vm1, %v332_v3  ;;  %261 = vmatprep.mubr.msk.f32.mxu0 %vm333_vm1, %v332_v3  ;;  %v35_v8 = vld [vmem:[#allocation3 + $0x8] sm:$0xff]  ;;  %v34_v9 = vld [vmem:[#allocation3] sm:$0xff]  ;;  %v37_v10 = vcvt.s32.f32 %v36_v7  ;;  %vm61_vm3 = vcmask 64512   ;;  %v334_v16 = vmov 0   ;;  %s335_s0 = smov [#allocation6]  }
  0x16   :  { %v41_v5 = vunpack.c.0.s8 %v40_v2  ;;  %265 = vmatpush3.msra.mxu1 %v35_v8  ;;  %260 = vmatpush3.msra.mxu0 %v34_v9  ;;  %vm30_vm4 = vcmask 254976   ;;  %vm210_vm5 = vcmask 1041409   ;;  %s244_s1 = sshll.u32 %s335_s0, 4  ;;  %s245_s1 = int_to_ptr.vmem [resolvable:$true] %s244_s1 }
  0x17   :  { %v218_v11 = vsel %vm217_vm2, %v37_v10, 0.0  ;;  %277 = vset.pattern.permute.xlu0 %v334_v16  ;;  %31 = vst.msk [vmem:[#allocation6] sm:$0x3] %vm30_vm4, %v332_v3  ;;  %s302_s25 = scalar_lea.vmem %s245_s1, 32  ;;  %p307_p9 = scmp.lt.s32.totalorder %s245_s1, %s245_s1 }
  0x18   :  { %v44_v6 = vsub.s32 %v41_v5, %v43_v4  ;;  %219 = vadd.xlane.f32.xlu0 %v218_v11  ;;  %p303_p8 = scmp.ne.s32.totalorder %s245_s1, %s302_s25  ;;  %p308_p10 = scmp.lt.s32.totalorder %s302_s25, %s302_s25 }
  0x1a   :  { %v45_v12 = vrot.slane %v37_v10, %v44_v6  ;;  %p309_p11 = por %p308_p10, %p307_p9 }
  0x1b   :  { %v216_v17 = vld [vmem:[#allocation2] sm:$0x3] }
  0x1c   :  { %v46_v13 = vcombine.high %v45_v12, %v45_v12  ;;  %v53_v14 = vrot.slane %v45_v12, %v44_v6  ;;  %p310_p12 = pnand %p309_p11, %p303_p8 }
  0x1e   :  { %v60_v15 = vrot.slane %v46_v13, %v44_v6  ;;  %262 = vmatmul.mubr.msk.f32.vlgmr.msra.gmra.mrb[0].mxu0 %vm61_vm3, %v53_v14  ;;  %v206_v28 = vld [vmem:[#allocation6] sm:$0x3] }
  0x20   :  { %267 = vmatmul.mubr.msk.f32.vlgmr.msra.gmra.mrb[0].mxu1 %vm61_vm3, %v60_v15 }
  0xa5   :  { %v220_v18 = vpop.xlane.xlu0 %219 }
  0xa6   :  { %v221_v19 = vadd.f32 %v220_v18, %v216_v17 }
  0xa8   :  { %223 = vst.msk [vmem:[#allocation2] sm:$0x3] %vm32_vm0, %v221_v19 }
  0xaf   :  { %v227_v20 = vld [vmem:[#allocation2] sm:$0x3] }
  0xb0   :  { %v228_v21 = vmax.f32 %v227_v20, 1e-09 }
  0xb2   :  { %278 = vrcp.f32 %v228_v21 }
  0xbc   :  { %v279_v22 = vpop.eup %278 }
  0xbd   :  { %233 = vperm.xlu0 %277, %v279_v22  }
  0xf1   :  { %v130_v23 = vpop.f32.mrb[0].mxu0 }
  0xf2   :  { %v263_v24 = vpop.f32.mrb[1].mxu0 }
  0xf3   :  { %v202_v25 = vpop.f32.mrb[0].mxu1 }
  0xf4   :  { %v209_v26 = vrot.slane %v202_v25, 7  ;;  %v268_v27 = vpop.f32.mrb[1].mxu1 }
  0xf6   :  { %v211_v29 = vsel %vm210_vm5, %v209_v26, %v130_v23 }
  0xf7   :  { %v213_v30 = vadd.f32 %v211_v29, %v206_v28 }
  0xf9   :  { %215 = vst.msk [vmem:[#allocation6] sm:$0x3] %vm30_vm4, %v213_v30 }
 0x100   :  { %v229_v31 = vld [vmem:[#allocation6] sm:$0x3] }
 0x13c   :  { %v234_v32 = vpop.permute.xlu0 %233 }
 0x13d   :  { %v236_v33 = vmul.f32 %v234_v32, %v229_v31 }
 0x13f   :  { %237 = vst.msk [vmem:[#allocation6] sm:$0x3] %vm30_vm4, %v236_v33 }
 0x140   :  { %313 = shalt.err (!%p310_p12)
}
 0x141   :  { %s314_s28 = scalar_lea.hbm %s385_s2, 32 }
 0x142   :  { %p315_p13 = scmp.ne.s32.totalorder %s385_s2, %s314_s28  ;;  %p318_p0 = scmp.lt.u32.totalorder %s314_s28, %s385_s2 }
 0x144   :  { %p320_p1 = pnand %p318_p0, %p315_p13 }
 0x146   :  { %323 = shalt.err (!%p320_p1)
}
 0x147   :  { %247 = dma.vmem_to_hbm [thread:$0]  %s245_s1, 32, %s385_s2, [#allocation5]  }
 0x148   :  { %326 = dma.done.wait [#allocation5], 32  }
 0x149   :  { %327 = vsyncadd [#allocation5], 4294967264 }
 0x14a   :  { %251 = vsyncpa [#allocation4], 1 }
 0x14b   :  { %252 = vsyncpa [#allocation5], 1 }

</bundles_post_ra>
